<compile_context>
chip_gen: v6e
topology: v6e:2x2x1
jax: 0.10.0
libtpu: 0.0.40
codegen_flags: <defaults>
</compile_context>

<pallas_src>
import functools

import jax
import jax.numpy as jnp
from jax import lax
from jax.experimental import pallas as pl
from jax.experimental.pallas import tpu as pltpu


def _round_up(x, m):
    return ((x + m - 1) // m) * m


def _cdiv(a, b):
    return (a + b - 1) // b


# ---------------------------------------------------------------------------
# Kernel factory
# ---------------------------------------------------------------------------
def _make_l1_partial_kernel(r_tile, t_tile, masked):
    """Per-tile kernel: masked sum of |pred - tgt| folded to an (8, 128)
    f32 partial, fully fused (no full-tile intermediates)."""
    n_lane_slabs = t_tile // 128
    r_chunk = min(r_tile, 128)  # <= 16 vregs per operand chunk

    def _body(pred_ref, tgt_ref, len_ref, out_ref):
        if masked:
            t_base = pl.program_id(1) * t_tile
            lens = len_ref[...]                      # (r_tile, 1) int32

        acc = jnp.zeros((8, 128), jnp.float32)
        for k in range(n_lane_slabs):
            lo = k * 128
            if masked:
                # Global column index of each lane in this 128-lane slab.
                t_idx = (t_base + lo) + lax.broadcasted_iota(
                    jnp.int32, (1, 128), 1)
            for r0 in range(0, r_tile, r_chunk):
                rows = min(r_chunk, r_tile - r0)
                # Cast to f32 BEFORE the subtract (accuracy for narrow
                # dtypes; free under the HBM bound).
                p = pred_ref[r0:r0 + rows, lo:lo + 128].astype(jnp.float32)
                t = tgt_ref[r0:r0 + rows, lo:lo + 128].astype(jnp.float32)
                d = jnp.abs(p - t)                   # (rows, 128) f32
                if masked:
                    # Select form (not multiply): also neutralizes NaN/Inf
                    # garbage in ragged edge-block padding.
                    d = jnp.where(t_idx < lens[r0:r0 + rows, :], d, 0.0)
                # Fold 8-row bands: (8,128)-aligned slices -> pure VPU adds.
                part = d[0:8, :]
                for b in range(1, rows // 8):
                    part = part + d[b * 8:(b + 1) * 8, :]
                acc = acc + part

        # Lane-dense, unmasked store of this tile's partial sum.
        out_ref[...] = acc.reshape(1, 1, 8, 128)

    if masked:
        def kernel(pred_ref, tgt_ref, len_ref, out_ref):
            _body(pred_ref, tgt_ref, len_ref, out_ref)
    else:
        def kernel(pred_ref, tgt_ref, out_ref):
            _body(pred_ref, tgt_ref, None, out_ref)
    return kernel


# ---------------------------------------------------------------------------
# Tile selection + pallas_call wrapper
# ---------------------------------------------------------------------------
_PER_INPUT_BLOCK_BYTES = 4 * 1024 * 1024   # ~4 MiB/input block; 2 inputs x
                                           # 2 buffers = 16 MiB (v7x-safe).


def _select_tiles(R, T, itemsize):
    budget_elems = _PER_INPUT_BLOCK_BYTES // itemsize
    t_tile = min(_round_up(T, 128), 2048)
    # Grow rows when T is small so blocks do not collapse to ~128 KiB.
    r_cap = max(8, min(4096, (budget_elems // t_tile) // 8 * 8))
    r_tile = min(_round_up(R, 8), r_cap)
    # Keep >= 2 grid steps when possible so both v7x TensorCores get work.
    if _cdiv(R, r_tile) * _cdiv(T, t_tile) < 2 and R > 8:
        r_tile = _round_up(_cdiv(R, 2), 8)
    return r_tile, t_tile


def _masked_l1_sum(pred2d, tgt2d, row_lengths=None):
    """float32 sum of |pred2d - tgt2d| over (row, t < row_lengths[row]);
    full sum when row_lengths is None."""
    R, T = pred2d.shape
    itemsize = jnp.dtype(pred2d.dtype).itemsize
    r_tile, t_tile = _select_tiles(R, T, itemsize)
    grid_r = _cdiv(R, r_tile)
    grid_t = _cdiv(T, t_tile)
    aligned = (R % r_tile == 0) and (T % t_tile == 0)

    # Masking is needed either for real lengths or to neutralize the
    # unspecified contents of ragged edge blocks (no jnp.pad of the big
    # inputs -> no extra HBM copy before the kernel).
    masked = (row_lengths is not None) or (not aligned)

    kernel = _make_l1_partial_kernel(r_tile, t_tile, masked)

    in_specs = [
        pl.BlockSpec((r_tile, t_tile), lambda i, j: (i, j)),
        pl.BlockSpec((r_tile, t_tile), lambda i, j: (i, j)),
    ]
    operands = [pred2d, tgt2d]
    if masked:
        if row_lengths is None:
            row_lengths = jnp.full((R,), T, dtype=jnp.int32)
        # Clamp for masking only (mask is identical for length >= T).  Only
        # this tiny length column gets explicitly zero-padded to the row
        # grid so its own edge blocks are well defined.
        r_pad = grid_r * r_tile
        len_col = jnp.zeros((r_pad, 1), jnp.int32).at[:R, 0].set(
            jnp.minimum(row_lengths.astype(jnp.int32), T))
        in_specs.append(pl.BlockSpec((r_tile, 1), lambda i, j: (i, 0)))
        operands.append(len_col)

    block_bytes = r_tile * t_tile * itemsize
    vmem_limit = min(48 * 1024 * 1024,
                     max(32 * 1024 * 1024, 4 * block_bytes + (8 << 20)))

    partials = pl.pallas_call(
        kernel,
        out_shape=jax.ShapeDtypeStruct((grid_r, grid_t, 8, 128), jnp.float32),
        grid=(grid_r, grid_t),
        in_specs=in_specs,
        out_specs=pl.BlockSpec((1, 1, 8, 128), lambda i, j: (i, j, 0, 0)),
        compiler_params=pltpu.CompilerParams(
            # No cross-step carry -> both axes parallel (megacore on v7x).
            dimension_semantics=("parallel", "parallel"),
            vmem_limit_bytes=vmem_limit,
        ),
    )(*operands)

    # Tiny final reduction of the partial-sum tensor in plain JAX.
    return jnp.sum(partials)


# ---------------------------------------------------------------------------
# Public loss (mirrors igoose L1Loss.forward)
# ---------------------------------------------------------------------------
@functools.partial(jax.jit, static_argnames=("loss_scale", "use_lengths"))
def l1_loss(prediction, target, length=None, *, loss_scale=1.0, use_lengths=True):
    """JAX/Pallas equivalent of igoose L1Loss.forward.

    prediction, target: [B, *dims, T]
    length:             [B] int (min over prediction/target length candidates,
                        computed by the caller, mirroring torch.stack(...).amin(0))
    """
    B = prediction.shape[0]
    T = prediction.shape[-1]
    C = 1
    for d in prediction.shape[1:-1]:
        C *= int(d)

    # Lane-dense 2-D view: row = (batch, flattened middle dims), col = T.
    pred2d = prediction.reshape(B * C, T)
    tgt2d = target.reshape(B * C, T)

    if use_lengths and length is not None:
        length = length.astype(jnp.int32)
        # Mask uses min(length, T) implicitly (torch mask only spans T
        # positions); the normalization uses the UNCLAMPED length.sum(),
        # exactly like the torch reference.
        row_len = jnp.repeat(length, C)
        masked_sum = _masked_l1_sum(pred2d, tgt2d, row_len)
        normalization = jnp.sum(length).astype(jnp.float32) * float(C)
        loss = masked_sum / jnp.maximum(normalization, 1.0)
    else:
        # F.l1_loss(prediction, target) -> mean over all elements.
        total = _masked_l1_sum(pred2d, tgt2d, None)
        loss = total / float(B * C * T)

    # TODO(synk): dict/key plumbing (output_map/data_map, dm.get_length_key)
    # is host-side Python in the original module and stays outside the kernel.
    return {"l1_loss": loss * loss_scale}


# ---------------------------------------------------------------------------
# Self-test
# ---------------------------------------------------------------------------
if __name__ == "__main__":
    key = jax.random.PRNGKey(0)
    k1, k2 = jax.random.split(key)

    B, Cc, T = 2, 4, 16
    prediction = jax.random.normal(k1, (B, Cc, T), dtype=jnp.float32)
    target = jax.random.normal(k2, (B, Cc, T), dtype=jnp.float32)
    # per-batch valid lengths (min of prediction/target length candidates)
    length = jnp.array([10, 16], dtype=jnp.int32)

    # Masked (length-aware) path — exercises ragged edge blocks (T=16 < 128).
    out_masked = l1_loss(prediction, target, length,
                         loss_scale=2.0, use_lengths=True)
    jax.block_until_ready(out_masked["l1_loss"])

    # Plain-mean path on the same unaligned shape (masked kernel, full rows).
    out_plain = l1_loss(prediction, target, None,
                        loss_scale=1.0, use_lengths=False)
    jax.block_until_ready(out_plain["l1_loss"])

    # Plain-mean path on a tile-aligned shape — exercises the unmasked kernel.
    B2, C2, T2 = 2, 4, 128
    p2 = jax.random.normal(k1, (B2, C2, T2), dtype=jnp.float32)
    t2 = jax.random.normal(k2, (B2, C2, T2), dtype=jnp.float32)
    out_aligned = l1_loss(p2, t2, None, loss_scale=1.0, use_lengths=False)
    jax.block_until_ready(out_aligned["l1_loss"])

    # Reference checks in plain JAX (mirror the torch formulas).
    diff = jnp.abs(prediction - target)
    mask = (jnp.arange(T)[None, :] < length[:, None]).astype(jnp.float32)
    ref_masked = (diff * mask[:, None, :]).sum() / jnp.maximum(
        length.sum().astype(jnp.float32) * Cc, 1.0) * 2.0
    ref_plain = diff.mean()
    ref_aligned = jnp.abs(p2 - t2).mean()

    assert jnp.allclose(out_masked["l1_loss"], ref_masked, rtol=1e-5, atol=1e-5)
    assert jnp.allclose(out_plain["l1_loss"], ref_plain, rtol=1e-5, atol=1e-5)
    assert jnp.allclose(out_aligned["l1_loss"], ref_aligned, rtol=1e-5, atol=1e-5)

    print("KERNEL_OK")
</pallas_src>

<mosaic_0001>
module attributes {stable_mosaic.version = 11 : i64} {
  func.func @kernel(%arg0: i32, %arg1: i32, %arg2: memref<8x128xf32, #tpu.memory_space<vmem>>, %arg3: memref<8x128xf32, #tpu.memory_space<vmem>>, %arg4: memref<8x1xi32, #tpu.memory_space<vmem>>, %arg5: memref<1x1x8x128xf32, #tpu.memory_space<vmem>>) attributes {dimension_semantics = [#tpu.dimension_semantics<parallel>, #tpu.dimension_semantics<parallel>], iteration_bounds = array<i64: 1, 1>, scalar_prefetch = 0 : i64, scratch_operands = 0 : i64, tpu.core_type = #tpu.core_type<tc>, window_params = [{transform_indices = @transform_0, window_bounds = array<i64: 8, 128>}, {transform_indices = @transform_1, window_bounds = array<i64: 8, 128>}, {transform_indices = @transform_2, window_bounds = array<i64: 8, 1>}, {transform_indices = @transform_3, window_bounds = array<i64: 1, 1, 8, 128>}]} {
    %c128_i32 = arith.constant 128 : i32
    %0 = arith.muli %arg1, %c128_i32 : i32
    %c0 = arith.constant 0 : index
    %c0_0 = arith.constant 0 : index
    %1 = vector.load %arg4[%c0, %c0_0] : memref<8x1xi32, #tpu.memory_space<vmem>>, vector<8x1xi32>
    %cst = arith.constant 0.000000e+00 : f32
    %2 = vector.broadcast %cst : f32 to vector<8x128xf32>
    %c0_i32 = arith.constant 0 : i32
    %3 = arith.addi %0, %c0_i32 : i32
    %4 = tpu.iota {dimensions = array<i32: 1>} : vector<1x128xi32>
    %5 = vector.broadcast %3 : i32 to vector<1x128xi32>
    %6 = arith.addi %5, %4 : vector<1x128xi32>
    %c0_1 = arith.constant 0 : index
    %c0_2 = arith.constant 0 : index
    %7 = vector.load %arg2[%c0_1, %c0_2] : memref<8x128xf32, #tpu.memory_space<vmem>>, vector<8x128xf32>
    %c0_3 = arith.constant 0 : index
    %c0_4 = arith.constant 0 : index
    %8 = vector.load %arg3[%c0_3, %c0_4] : memref<8x128xf32, #tpu.memory_space<vmem>>, vector<8x128xf32>
    %9 = arith.subf %7, %8 : vector<8x128xf32>
    %10 = math.absf %9 : vector<8x128xf32>
    %11 = vector.broadcast %6 : vector<1x128xi32> to vector<8x128xi32>
    %12 = vector.broadcast %1 : vector<8x1xi32> to vector<8x128xi32>
    %13 = arith.cmpi slt, %11, %12 : vector<8x128xi32>
    %cst_5 = arith.constant 0.000000e+00 : f32
    %14 = vector.broadcast %cst_5 : f32 to vector<8x128xf32>
    %15 = arith.select %13, %10, %14 : vector<8x128xi1>, vector<8x128xf32>
    %16 = arith.addf %2, %15 : vector<8x128xf32>
    %17 = vector.shape_cast %16 : vector<8x128xf32> to vector<1x1x8x128xf32>
    %c0_6 = arith.constant 0 : index
    %c0_7 = arith.constant 0 : index
    %c0_8 = arith.constant 0 : index
    %c0_9 = arith.constant 0 : index
    %18 = vector.load %arg5[%c0_6, %c0_7, %c0_8, %c0_9] : memref<1x1x8x128xf32, #tpu.memory_space<vmem>>, vector<1x1x8x128xf32>
    tpu.vector_store %arg5[%c0_6, %c0_7, %c0_8, %c0_9], %17 {strides = array<i32>} : memref<1x1x8x128xf32, #tpu.memory_space<vmem>>, vector<1x1x8x128xf32>,
    return
  }
  func.func @transform_0(%arg0: i32, %arg1: i32) -> (i32, i32) {
    %c0_i32 = arith.constant 0 : i32
    return %arg0, %arg1 : i32, i32
  }
  func.func @transform_1(%arg0: i32, %arg1: i32) -> (i32, i32) {
    %c0_i32 = arith.constant 0 : i32
    return %arg0, %arg1 : i32, i32
  }
  func.func @transform_2(%arg0: i32, %arg1: i32) -> (i32, i32) {
    %c0_i32 = arith.constant 0 : i32
    %c0_i32_0 = arith.constant 0 : i32
    return %arg0, %c0_i32 : i32, i32
  }
  func.func @transform_3(%arg0: i32, %arg1: i32) -> (i32, i32, i32, i32) {
    %c0_i32 = arith.constant 0 : i32
    %c0_i32_0 = arith.constant 0 : i32
    %c0_i32_1 = arith.constant 0 : i32
    return %arg0, %arg1, %c0_i32, %c0_i32_0 : i32, i32, i32, i32
  }
}

</mosaic_0001>

<bundles_post_ra>
// kernel: l1_loss.1
= control target key start
LH: loop header
LB: loop body
LE: loop exit
PB: predicated region body
PF: predicated region fallthrough
CT: control target
= control target key end

     0   :  { %v37_v0 = vmov 0   ;;  %v16_v4 = vlaneseq  ;;  %s70_s2 = inlined_call_operand.vmem [shape: s32[8,1], index: 2, kind: input, shape index: {}]   ;;  %s71_s0 = inlined_call_operand.vmem [shape: f32[8,16], index: 0, kind: input, shape index: {}]   ;;  %s72_s1 = inlined_call_operand.vmem [shape: f32[8,16], index: 1, kind: input, shape index: {}]   ;;  %s73_s3 = inlined_call_operand.vmem [shape: f32[1,1,8,128], index: 3, kind: output, shape index: {}]  }
   0x1   :  { %36 = vset.pattern.permute.xlu0 %v37_v0  ;;  %v15_v1 = vld [vmem:[%s70_s2] sm:$0xff] }
   0x2   :  { %25 = vperm.xlu0 %36, %v15_v1   ;;  %v20_v2 = vld [vmem:[%s71_s0] sm:$0xff]  ;;  %v17_v6 = vand.u32 127, %v16_v4 }
   0x3   :  { %v21_v3 = vld [vmem:[%s72_s1] sm:$0xff] }
   0x4   :  { %v22_v5 = vsub.f32 %v20_v2, %v21_v3 }
   0x6   :  { %v23_v7 = vand.u32 2147483647, %v22_v5 }
  0x7d   :  { %v26_v8 = vpop.permute.xlu0 %25 }
  0x7e   :  { %vm27_vm0 = vcmp.lt.s32.totalorder %v17_v6, %v26_v8 }
  0x7f   :  { %v28_v9 = vsel %vm27_vm0, %v23_v7, 0.0 }
  0x80   :  { %30 = vst [vmem:[%s73_s3] sm:$0xff] %v28_v9 }

</bundles_post_ra>
